<compile_context>
chip_gen: v7x
topology: tpu7x:2x2x1
jax: 0.10.0
libtpu: 0.0.40
codegen_flags: <defaults>
</compile_context>

<pallas_src>
import functools

import jax
import jax.numpy as jnp
from jax.experimental import pallas as pl
from jax.experimental.pallas import tpu as pltpu


def portattention_kernel(x_ref, wmu_ref, wstd_ref, bias_ref, mu_ref, std_ref):
    # x_ref    : (Bt, C, L)  VMEM block   (lane axis = pred_len -> lane dense)
    # wmu_ref  : (C, L)      VMEM resident  gamma[c] * W_mu_eff[l, c]
    # wstd_ref : (C, L)      VMEM resident  gamma[c] * W_std_eff[l, c]
    # bias_ref : (1, 2)      VMEM resident  [bias_mu_eff, bias_std_eff]
    # mu_ref   : (Bt, 1)     VMEM
    # std_ref  : (Bt, 1)     VMEM
    x = x_ref[...].astype(jnp.float32)                  # cast after DMA (bf16 ok)

    # LayerNorm statistics over c_out (sublane axis), eps = 1e-5.
    # gamma/beta are folded into the effective weights / bias, so only the
    # standardized tensor z is needed here.
    mean = jnp.mean(x, axis=1, keepdims=True)           # (Bt, 1, L)
    xc = x - mean
    var = jnp.mean(xc * xc, axis=1, keepdims=True)
    z = xc * jax.lax.rsqrt(var + 1e-5)                  # (Bt, C, L)

    # Folded Conv1d(k=3, pad=1) + fc heads:
    #   mu[b]  = sum_{c,l} z[b,c,l] * wmu[c,l]  + bias_mu_eff
    #   std[b] = softplus(sum_{c,l} z[b,c,l] * wstd[c,l] + bias_std_eff)
    rm = jnp.sum(z * wmu_ref[...], axis=1)               # (Bt, L) sublane reduce
    rs = jnp.sum(z * wstd_ref[...], axis=1)              # (Bt, L)
    b = bias_ref[...]                                    # (1, 2)
    mu = jnp.sum(rm, axis=-1, keepdims=True) + b[:, 0:1]  # (Bt, 1)
    st = jnp.sum(rs, axis=-1, keepdims=True) + b[:, 1:2]  # (Bt, 1)

    mu_ref[...] = mu
    std_ref[...] = jax.nn.softplus(st)


def _pick_batch_tile(batch, c, length, itemsize):
    """Batch tile sized to a conservative per-buffer VMEM budget (~4 MiB).

    With double buffering this stays well inside the default scoped VMEM on
    v5e (16 MiB), v6e (32 MiB) and v7x (32 MiB of 64 MiB physical)."""
    budget = 4 * 1024 * 1024
    rows = budget // max(1, c * length * itemsize)
    rows = max(128, (rows // 128) * 128)
    rows = min(rows, 2048)
    if batch <= rows:
        return batch, batch                  # single block, no padding
    b_tile = rows
    b_pad = pl.cdiv(batch, b_tile) * b_tile
    return b_tile, b_pad


@jax.jit
def portattention_forward(x, gamma, beta, conv_w, conv_b, mu_w, mu_b, std_w, std_b):
    """x: (B, pred_len, c_out).  Returns (mu, std), each shape (B,) float32."""
    B, L, C = x.shape
    f32 = jnp.float32

    # --- fold Conv1d + fc heads into effective (L, C) weights -------------
    # conv_scores[b,t] = sum_{c,k} normed[b,t+k-1,c] * cw[c,k] + conv_b
    # head[b]          = sum_t conv_scores[b,t] * fw[t] + fb
    #                  = sum_{s,c} normed[b,s,c] * W[s,c] + (conv_b*sum(fw) + fb)
    # with W[s,c] = sum_k cw[c,k] * fw[s+1-k] (zero-padded).
    cw = conv_w.reshape(C, 3).astype(f32)                      # (C, 3)

    def eff_weight(fw):
        fwv = fw.reshape(L).astype(f32)
        fwp = jnp.pad(fwv, (1, 1))                             # (L+2,)
        shifts = jnp.stack([fwp[2:2 + L], fwp[1:1 + L], fwp[0:L]], axis=1)  # (L, 3)
        return shifts @ cw.T                                   # (L, C)

    w_mu = eff_weight(mu_w)
    w_std = eff_weight(std_w)

    g = gamma.reshape(1, C).astype(f32)
    be = beta.reshape(1, C).astype(f32)
    cb = conv_b.reshape(()).astype(f32)

    # normed = z*gamma + beta  ->  gamma folded into weights, beta into bias.
    wgmu = jnp.transpose(w_mu * g)                             # (C, L)
    wgstd = jnp.transpose(w_std * g)                           # (C, L)
    bias_mu = jnp.sum(be * w_mu) + cb * jnp.sum(mu_w.astype(f32)) \
        + mu_b.reshape(()).astype(f32)
    bias_std = jnp.sum(be * w_std) + cb * jnp.sum(std_w.astype(f32)) \
        + std_b.reshape(()).astype(f32)
    biases = jnp.stack([bias_mu, bias_std]).reshape(1, 2)      # (1, 2)

    # --- lane-dense layout: pred_len on the lane axis ----------------------
    xt = jnp.transpose(x, (0, 2, 1))                           # (B, C, L), native dtype
    b_tile, b_pad = _pick_batch_tile(B, C, L, xt.dtype.itemsize)
    if b_pad != B:
        xt = jnp.pad(xt, ((0, b_pad - B), (0, 0), (0, 0)))
    grid = (b_pad // b_tile,)

    mu, std = pl.pallas_call(
        portattention_kernel,
        grid=grid,
        out_shape=(jax.ShapeDtypeStruct((b_pad, 1), f32),
                   jax.ShapeDtypeStruct((b_pad, 1), f32)),
        in_specs=[
            pl.BlockSpec((b_tile, C, L), lambda i: (i, 0, 0)),   # x (pipelined)
            pl.BlockSpec((C, L), lambda i: (0, 0)),              # wgmu (resident)
            pl.BlockSpec((C, L), lambda i: (0, 0)),              # wgstd (resident)
            pl.BlockSpec((1, 2), lambda i: (0, 0)),              # biases (resident)
        ],
        out_specs=(pl.BlockSpec((b_tile, 1), lambda i: (i, 0)),
                   pl.BlockSpec((b_tile, 1), lambda i: (i, 0))),
        compiler_params=pltpu.CompilerParams(
            dimension_semantics=("parallel",)),
    )(xt, wgmu, wgstd, biases)
    return mu[:B, 0], std[:B, 0]


def reference(x, gamma, beta, conv_w, conv_b, mu_w, mu_b, std_w, std_b):
    """Pure-JAX reference mirroring the PyTorch forward."""
    mean = jnp.mean(x, axis=-1, keepdims=True)
    var = jnp.mean(jnp.square(x - mean), axis=-1, keepdims=True)
    normed = (x - mean) / jnp.sqrt(var + 1e-5) * gamma + beta       # (B, L, C)
    n = jnp.transpose(normed, (0, 2, 1))                            # (B, C, L)
    conv = jax.lax.conv_general_dilated(
        n, conv_w, window_strides=(1,), padding="SAME",
        dimension_numbers=("NCH", "OIH", "NCH"))[:, 0, :] + conv_b[0]
    mu = conv @ mu_w[0] + mu_b[0]
    std = jax.nn.softplus(conv @ std_w[0] + std_b[0])
    return mu, std


if __name__ == "__main__":
    # Small synthetic config: batch (num_stocks) B=8, pred_len=16, c_out=8
    B, L, C = 8, 16, 8
    key = jax.random.PRNGKey(0)
    ks = jax.random.split(key, 9)

    x = jax.random.normal(ks[0], (B, L, C), jnp.float32)

    # Deterministic parameter init (shapes from Portattention.__init__)
    gamma = 1.0 + 0.1 * jax.random.normal(ks[7], (C,), jnp.float32)   # LN weight
    beta = 0.1 * jax.random.normal(ks[8], (C,), jnp.float32)          # LN bias
    conv_w = 0.2 * jax.random.normal(ks[1], (1, C, 3), jnp.float32)   # Conv1d weight
    conv_b = 0.1 * jax.random.normal(ks[2], (1,), jnp.float32)        # Conv1d bias
    mu_w = 0.2 * jax.random.normal(ks[3], (1, L), jnp.float32)        # fc_mu weight
    mu_b = 0.1 * jax.random.normal(ks[4], (1,), jnp.float32)          # fc_mu bias
    std_w = 0.2 * jax.random.normal(ks[5], (1, L), jnp.float32)       # fc_std weight
    std_b = 0.1 * jax.random.normal(ks[6], (1,), jnp.float32)         # fc_std bias

    mu, std = portattention_forward(x, gamma, beta, conv_w, conv_b,
                                    mu_w, mu_b, std_w, std_b)
    jax.block_until_ready((mu, std))

    mu_ref, std_ref = reference(x, gamma, beta, conv_w, conv_b,
                                mu_w, mu_b, std_w, std_b)
    assert mu.shape == (B,) and std.shape == (B,)
    assert jnp.allclose(mu, mu_ref, rtol=1e-4, atol=1e-4), (mu, mu_ref)
    assert jnp.allclose(std, std_ref, rtol=1e-4, atol=1e-4), (std, std_ref)

    print("KERNEL_OK")
</pallas_src>

<mosaic_0001>
module attributes {stable_mosaic.version = 11 : i64} {
  func.func @portattention_kernel(%arg0: i32, %arg1: memref<8x8x16xf32, #tpu.memory_space<vmem>>, %arg2: memref<8x16xf32, #tpu.memory_space<vmem>>, %arg3: memref<8x16xf32, #tpu.memory_space<vmem>>, %arg4: memref<1x2xf32, #tpu.memory_space<vmem>>, %arg5: memref<8x1xf32, #tpu.memory_space<vmem>>, %arg6: memref<8x1xf32, #tpu.memory_space<vmem>>) attributes {dimension_semantics = [#tpu.dimension_semantics<parallel>], iteration_bounds = array<i64: 1>, scalar_prefetch = 0 : i64, scratch_operands = 0 : i64, tpu.core_type = #tpu.core_type<tc>, window_params = [{transform_indices = @transform_0, window_bounds = array<i64: 8, 8, 16>}, {pipeline_mode = #tpu.pipeline_mode<synchronous>, transform_indices = @transform_1, window_bounds = array<i64: 8, 16>}, {pipeline_mode = #tpu.pipeline_mode<synchronous>, transform_indices = @transform_2, window_bounds = array<i64: 8, 16>}, {pipeline_mode = #tpu.pipeline_mode<synchronous>, transform_indices = @transform_3, window_bounds = array<i64: 1, 2>}, {transform_indices = @transform_4, window_bounds = array<i64: 8, 1>}, {transform_indices = @transform_5, window_bounds = array<i64: 8, 1>}]} {
    %c0 = arith.constant 0 : index
    %c0_0 = arith.constant 0 : index
    %c0_1 = arith.constant 0 : index
    %0 = vector.load %arg1[%c0, %c0_0, %c0_1] : memref<8x8x16xf32, #tpu.memory_space<vmem>>, vector<8x8x16xf32>
    %cst = arith.constant dense<0.000000e+00> : vector<8x16xf32>
    %1 = vector.multi_reduction <add>, %0, %cst [1] : vector<8x8x16xf32> to vector<8x16xf32>
    %2 = vector.shape_cast %1 : vector<8x16xf32> to vector<8x1x16xf32>
    %cst_2 = arith.constant 8.000000e+00 : f32
    %3 = vector.broadcast %cst_2 : f32 to vector<8x1x16xf32>
    %4 = arith.divf %2, %3 : vector<8x1x16xf32>
    %5 = vector.broadcast %4 : vector<8x1x16xf32> to vector<8x8x16xf32>
    %6 = arith.subf %0, %5 : vector<8x8x16xf32>
    %7 = arith.mulf %6, %6 : vector<8x8x16xf32>
    %cst_3 = arith.constant dense<0.000000e+00> : vector<8x16xf32>
    %8 = vector.multi_reduction <add>, %7, %cst_3 [1] : vector<8x8x16xf32> to vector<8x16xf32>
    %9 = vector.shape_cast %8 : vector<8x16xf32> to vector<8x1x16xf32>
    %cst_4 = arith.constant 8.000000e+00 : f32
    %10 = vector.broadcast %cst_4 : f32 to vector<8x1x16xf32>
    %11 = arith.divf %9, %10 : vector<8x1x16xf32>
    %cst_5 = arith.constant 9.99999974E-6 : f32
    %12 = vector.broadcast %cst_5 : f32 to vector<8x1x16xf32>
    %13 = arith.addf %11, %12 : vector<8x1x16xf32>
    %14 = math.rsqrt %13 : vector<8x1x16xf32>
    %15 = vector.broadcast %14 : vector<8x1x16xf32> to vector<8x8x16xf32>
    %16 = arith.mulf %6, %15 : vector<8x8x16xf32>
    %c0_6 = arith.constant 0 : index
    %c0_7 = arith.constant 0 : index
    %17 = vector.load %arg2[%c0_6, %c0_7] : memref<8x16xf32, #tpu.memory_space<vmem>>, vector<8x16xf32>
    %18 = vector.shape_cast %17 : vector<8x16xf32> to vector<1x8x16xf32>
    %19 = vector.broadcast %18 : vector<1x8x16xf32> to vector<8x8x16xf32>
    %20 = arith.mulf %16, %19 : vector<8x8x16xf32>
    %cst_8 = arith.constant dense<0.000000e+00> : vector<8x16xf32>
    %21 = vector.multi_reduction <add>, %20, %cst_8 [1] : vector<8x8x16xf32> to vector<8x16xf32>
    %c0_9 = arith.constant 0 : index
    %c0_10 = arith.constant 0 : index
    %22 = vector.load %arg3[%c0_9, %c0_10] : memref<8x16xf32, #tpu.memory_space<vmem>>, vector<8x16xf32>
    %23 = vector.shape_cast %22 : vector<8x16xf32> to vector<1x8x16xf32>
    %24 = vector.broadcast %23 : vector<1x8x16xf32> to vector<8x8x16xf32>
    %25 = arith.mulf %16, %24 : vector<8x8x16xf32>
    %cst_11 = arith.constant dense<0.000000e+00> : vector<8x16xf32>
    %26 = vector.multi_reduction <add>, %25, %cst_11 [1] : vector<8x8x16xf32> to vector<8x16xf32>
    %c0_12 = arith.constant 0 : index
    %c0_13 = arith.constant 0 : index
    %27 = vector.load %arg4[%c0_12, %c0_13] : memref<1x2xf32, #tpu.memory_space<vmem>>, vector<1x2xf32>
    %cst_14 = arith.constant dense<0.000000e+00> : vector<8xf32>
    %28 = vector.multi_reduction <add>, %21, %cst_14 [1] : vector<8x16xf32> to vector<8xf32>
    %29 = vector.shape_cast %28 : vector<8xf32> to vector<8x1xf32>
    %30 = vector.extract_strided_slice %27 {offsets = [0, 0], sizes = [1, 1], strides = [1, 1]} : vector<1x2xf32> to vector<1x1xf32>
    %31 = vector.broadcast %30 : vector<1x1xf32> to vector<8x1xf32>
    %32 = arith.addf %29, %31 : vector<8x1xf32>
    %cst_15 = arith.constant dense<0.000000e+00> : vector<8xf32>
    %33 = vector.multi_reduction <add>, %26, %cst_15 [1] : vector<8x16xf32> to vector<8xf32>
    %34 = vector.shape_cast %33 : vector<8xf32> to vector<8x1xf32>
    %35 = vector.extract_strided_slice %27 {offsets = [0, 1], sizes = [1, 1], strides = [1, 1]} : vector<1x2xf32> to vector<1x1xf32>
    %36 = vector.broadcast %35 : vector<1x1xf32> to vector<8x1xf32>
    %37 = arith.addf %34, %36 : vector<8x1xf32>
    %c0_16 = arith.constant 0 : index
    %c0_17 = arith.constant 0 : index
    %38 = vector.load %arg5[%c0_16, %c0_17] : memref<8x1xf32, #tpu.memory_space<vmem>>, vector<8x1xf32>
    tpu.vector_store %arg5[%c0_16, %c0_17], %32 {strides = array<i32>} : memref<8x1xf32, #tpu.memory_space<vmem>>, vector<8x1xf32>,
    %cst_18 = arith.constant 0.000000e+00 : f32
    %39 = vector.broadcast %cst_18 : f32 to vector<8x1xf32>
    %40 = arith.maximumf %37, %39 : vector<8x1xf32>
    %41 = vector.broadcast %cst_18 : f32 to vector<8x1xf32>
    %42 = arith.subf %37, %41 : vector<8x1xf32>
    %43 = arith.cmpf one, %42, %42 : vector<8x1xf32>
    %44 = vector.broadcast %cst_18 : f32 to vector<8x1xf32>
    %45 = arith.addf %37, %44 : vector<8x1xf32>
    %46 = math.absf %42 : vector<8x1xf32>
    %cst_19 = arith.constant 0.000000e+00 : f32
    %47 = vector.broadcast %cst_19 : f32 to vector<8x1xf32>
    %48 = arith.subf %47, %46 : vector<8x1xf32>
    %49 = math.exp %48 : vector<8x1xf32>
    %50 = math.log1p %49 : vector<8x1xf32>
    %51 = arith.addf %40, %50 : vector<8x1xf32>
    %52 = arith.select %43, %45, %51 : vector<8x1xi1>, vector<8x1xf32>
    %c0_20 = arith.constant 0 : index
    %c0_21 = arith.constant 0 : index
    %53 = vector.load %arg6[%c0_20, %c0_21] : memref<8x1xf32, #tpu.memory_space<vmem>>, vector<8x1xf32>
    tpu.vector_store %arg6[%c0_20, %c0_21], %52 {strides = array<i32>} : memref<8x1xf32, #tpu.memory_space<vmem>>, vector<8x1xf32>,
    return
  }
  func.func @transform_0(%arg0: i32) -> (i32, i32, i32) {
    %c0_i32 = arith.constant 0 : i32
    %c0_i32_0 = arith.constant 0 : i32
    %c0_i32_1 = arith.constant 0 : i32
    return %arg0, %c0_i32, %c0_i32_0 : i32, i32, i32
  }
  func.func @transform_1(%arg0: i32) -> (i32, i32) {
    %c0_i32 = arith.constant 0 : i32
    %c0_i32_0 = arith.constant 0 : i32
    %c0_i32_1 = arith.constant 0 : i32
    return %c0_i32, %c0_i32_0 : i32, i32
  }
  func.func @transform_2(%arg0: i32) -> (i32, i32) {
    %c0_i32 = arith.constant 0 : i32
    %c0_i32_0 = arith.constant 0 : i32
    %c0_i32_1 = arith.constant 0 : i32
    return %c0_i32, %c0_i32_0 : i32, i32
  }
  func.func @transform_3(%arg0: i32) -> (i32, i32) {
    %c0_i32 = arith.constant 0 : i32
    %c0_i32_0 = arith.constant 0 : i32
    %c0_i32_1 = arith.constant 0 : i32
    return %c0_i32, %c0_i32_0 : i32, i32
  }
  func.func @transform_4(%arg0: i32) -> (i32, i32) {
    %c0_i32 = arith.constant 0 : i32
    %c0_i32_0 = arith.constant 0 : i32
    return %arg0, %c0_i32 : i32, i32
  }
  func.func @transform_5(%arg0: i32) -> (i32, i32) {
    %c0_i32 = arith.constant 0 : i32
    %c0_i32_0 = arith.constant 0 : i32
    return %arg0, %c0_i32 : i32, i32
  }
}

</mosaic_0001>

<bundles_post_ra>
// kernel: portattention_forward.1
= control target key start
LH: loop header
LB: loop body
LE: loop exit
PB: predicated region body
PF: predicated region fallthrough
CT: control target
= control target key end

     0   :  { %vm27_vm0 = vcmask 130048   ;;  %vm336_vm1 = vcmask 1041409   ;;  %vm338_vm2 = vcmask 1042434   ;;  %vm340_vm3 = vcmask 1043459   ;;  %s660_s0 = inlined_call_operand.vmem [shape: f32[8,8,16], index: 0, kind: input, shape index: {}]   ;;  %s661_s2 = inlined_call_operand.vmem [shape: f32[8,16], index: 2, kind: input, shape index: {}]   ;;  %s662_s1 = inlined_call_operand.vmem [shape: f32[8,16], index: 1, kind: input, shape index: {}]   ;;  %s663_s3 = inlined_call_operand.vmem [shape: f32[1,2], index: 3, kind: input, shape index: {}]   ;;  %s664_s4 = inlined_call_operand.vmem [shape: f32[8,1], index: 4, kind: output, shape index: {0}]   ;;  %s665_s5 = inlined_call_operand.vmem [shape: f32[8,1], index: 5, kind: output, shape index: {1}]  }
   0x1   :  { %v470_v0 = vld [vmem:[%s660_s0] sm:$0xff]  ;;  %v475_v1 = vld [vmem:[%s660_s0 + $0x8] sm:$0xff]  ;;  %v480_v2 = vld [vmem:[%s660_s0 + $0x10] sm:$0xff]  ;;  %vm342_vm4 = vcmask 1044484   ;;  %vm344_vm5 = vcmask 1045509   ;;  %vm346_vm6 = vcmask 1046534  }
   0x2   :  { %v485_v3 = vld [vmem:[%s660_s0 + $0x18] sm:$0xff]  ;;  %v490_v4 = vld [vmem:[%s660_s0 + $0x20] sm:$0xff]  ;;  %v495_v5 = vld [vmem:[%s660_s0 + $0x28] sm:$0xff]  ;;  %v28_v6 = vsel %vm27_vm0, %v470_v0, 0.0  ;;  %v35_v7 = vsel %vm27_vm0, %v475_v1, 0.0  ;;  %v42_v8 = vsel %vm27_vm0, %v480_v2, 0.0 }
   0x3   :  { %v506_v9 = vld [vmem:[%s660_s0 + $0x30] sm:$0xff]  ;;  %v511_v10 = vld [vmem:[%s660_s0 + $0x38] sm:$0xff]  ;;  %v29_v11 = vrot.slane %v28_v6, 4  ;;  %v36_v12 = vrot.slane %v35_v7, 4  ;;  %v43_v13 = vrot.slane %v42_v8, 4  ;;  %v49_v14 = vsel %vm27_vm0, %v485_v3, 0.0 }
   0x4   :  { %v50_v15 = vrot.slane %v49_v14, 4  ;;  %v56_v16 = vsel %vm27_vm0, %v490_v4, 0.0  ;;  %v63_v17 = vsel %vm27_vm0, %v495_v5, 0.0  ;;  %v70_v18 = vsel %vm27_vm0, %v506_v9, 0.0 }
   0x5   :  { %v30_v19 = vadd.f32 %v29_v11, %v28_v6  ;;  %v37_v20 = vadd.f32 %v36_v12, %v35_v7  ;;  %v44_v21 = vadd.f32 %v43_v13, %v42_v8  ;;  %v57_v22 = vrot.slane %v56_v16, 4 }
   0x6   :  { %v51_v23 = vadd.f32 %v50_v15, %v49_v14  ;;  %v64_v24 = vrot.slane %v63_v17, 4  ;;  %v71_v25 = vrot.slane %v70_v18, 4  ;;  %v77_v26 = vsel %vm27_vm0, %v511_v10, 0.0 }
   0x7   :  { %v31_v27 = vrot.slane %v30_v19, 2  ;;  %v38_v28 = vrot.slane %v37_v20, 2  ;;  %v45_v29 = vrot.slane %v44_v21, 2  ;;  %v58_v30 = vadd.f32 %v57_v22, %v56_v16 }
   0x8   :  { %v52_v31 = vrot.slane %v51_v23, 2  ;;  %v65_v32 = vadd.f32 %v64_v24, %v63_v17  ;;  %v72_v33 = vadd.f32 %v71_v25, %v70_v18  ;;  %v78_v34 = vrot.slane %v77_v26, 4 }
   0x9   :  { %v32_v35 = vadd.f32 %v31_v27, %v30_v19  ;;  %v39_v36 = vadd.f32 %v38_v28, %v37_v20  ;;  %v46_v37 = vadd.f32 %v45_v29, %v44_v21  ;;  %v59_v38 = vrot.slane %v58_v30, 2 }
   0xa   :  { %v53_v39 = vadd.f32 %v52_v31, %v51_v23  ;;  %v66_v40 = vrot.slane %v65_v32, 2  ;;  %v73_v41 = vrot.slane %v72_v33, 2  ;;  %v79_v42 = vadd.f32 %v78_v34, %v77_v26 }
   0xb   :  { %v33_v43 = vrot.slane %v32_v35, 1  ;;  %v40_v44 = vrot.slane %v39_v36, 1  ;;  %v47_v45 = vrot.slane %v46_v37, 1  ;;  %v60_v46 = vadd.f32 %v59_v38, %v58_v30 }
   0xc   :  { %v54_v47 = vrot.slane %v53_v39, 1  ;;  %v67_v48 = vadd.f32 %v66_v40, %v65_v32  ;;  %v74_v49 = vadd.f32 %v73_v41, %v72_v33  ;;  %v80_v50 = vrot.slane %v79_v42, 2 }
   0xd   :  { %v34_v51 = vadd.f32 %v33_v43, %v32_v35  ;;  %v41_v52 = vadd.f32 %v40_v44, %v39_v36  ;;  %v48_v53 = vadd.f32 %v47_v45, %v46_v37  ;;  %v61_v54 = vrot.slane %v60_v46, 1 }
   0xe   :  { %v55_v55 = vadd.f32 %v54_v47, %v53_v39  ;;  %v68_v56 = vrot.slane %v67_v48, 1  ;;  %v75_v57 = vrot.slane %v74_v49, 1  ;;  %v81_v58 = vadd.f32 %v80_v50, %v79_v42 }
   0xf   :  { %v62_v59 = vadd.f32 %v61_v54, %v60_v46  ;;  %v85_v60 = vmul.f32 0.125, %v34_v51  ;;  %v86_v61 = vmul.f32 0.125, %v41_v52  ;;  %v87_v62 = vmul.f32 0.125, %v48_v53 }
  0x10   :  { %v69_v63 = vadd.f32 %v68_v56, %v67_v48  ;;  %v76_v6 = vadd.f32 %v75_v57, %v74_v49  ;;  %v82_v7 = vrot.slane %v81_v58, 1  ;;  %v88_v8 = vmul.f32 0.125, %v55_v55 }
  0x11   :  { %v89_v11 = vmul.f32 0.125, %v62_v59  ;;  %v524_v12 = vsub.f32 %v470_v0, %v85_v60  ;;  %v527_v13 = vsub.f32 %v475_v1, %v86_v61  ;;  %v530_v14 = vsub.f32 %v480_v2, %v87_v62 }
  0x12   :  { %v83_v15 = vadd.f32 %v82_v7, %v81_v58  ;;  %v90_v16 = vmul.f32 0.125, %v69_v63  ;;  %v91_v17 = vmul.f32 0.125, %v76_v6  ;;  %v533_v18 = vsub.f32 %v485_v3, %v88_v8 }
  0x13   :  { %v536_v19 = vsub.f32 %v490_v4, %v89_v11  ;;  %v101_v20 = vmul.f32 %v524_v12, %v524_v12  ;;  %v102_v0 = vmul.f32 %v527_v13, %v527_v13  ;;  %v103_v1 = vmul.f32 %v530_v14, %v530_v14 }
  0x14   :  { %v92_v2 = vmul.f32 0.125, %v83_v15  ;;  %v545_v21 = vsub.f32 %v495_v5, %v90_v16  ;;  %v548_v22 = vsub.f32 %v506_v9, %v91_v17  ;;  %v104_v3 = vmul.f32 %v533_v18, %v533_v18 }
  0x15   :  { %v105_v4 = vmul.f32 %v536_v19, %v536_v19  ;;  %v109_v23 = vsel %vm27_vm0, %v101_v20, 0.0  ;;  %v116_v24 = vsel %vm27_vm0, %v102_v0, 0.0  ;;  %v123_v25 = vsel %vm27_vm0, %v103_v1, 0.0 }
  0x16   :  { %v558_v26 = vsub.f32 %v511_v10, %v92_v2  ;;  %v106_v5 = vmul.f32 %v545_v21, %v545_v21  ;;  %v107_v9 = vmul.f32 %v548_v22, %v548_v22  ;;  %v110_v27 = vrot.slane %v109_v23, 4 }
  0x17   :  { %v117_v28 = vrot.slane %v116_v24, 4  ;;  %v124_v29 = vrot.slane %v123_v25, 4  ;;  %v130_v30 = vsel %vm27_vm0, %v104_v3, 0.0  ;;  %v137_v31 = vsel %vm27_vm0, %v105_v4, 0.0 }
  0x18   :  { %v108_v32 = vmul.f32 %v558_v26, %v558_v26  ;;  %v111_v33 = vadd.f32 %v110_v27, %v109_v23  ;;  %v131_v34 = vrot.slane %v130_v30, 4  ;;  %v138_v10 = vrot.slane %v137_v31, 4 }
  0x19   :  { %v118_v35 = vadd.f32 %v117_v28, %v116_v24  ;;  %v125_v36 = vadd.f32 %v124_v29, %v123_v25  ;;  %v144_v37 = vsel %vm27_vm0, %v106_v5, 0.0  ;;  %v151_v38 = vsel %vm27_vm0, %v107_v9, 0.0 }
  0x1a   :  { %v112_v39 = vrot.slane %v111_v33, 2  ;;  %v132_v40 = vadd.f32 %v131_v34, %v130_v30  ;;  %v139_v41 = vadd.f32 %v138_v10, %v137_v31  ;;  %v145_v42 = vrot.slane %v144_v37, 4 }
  0x1b   :  { %v119_v43 = vrot.slane %v118_v35, 2  ;;  %v126_v44 = vrot.slane %v125_v36, 2  ;;  %v152_v45 = vrot.slane %v151_v38, 4  ;;  %v158_v46 = vsel %vm27_vm0, %v108_v32, 0.0 }
  0x1c   :  { %v113_v47 = vadd.f32 %v112_v39, %v111_v33  ;;  %v133_v48 = vrot.slane %v132_v40, 2  ;;  %v140_v49 = vrot.slane %v139_v41, 2  ;;  %v146_v50 = vadd.f32 %v145_v42, %v144_v37 }
  0x1d   :  { %v120_v51 = vadd.f32 %v119_v43, %v118_v35  ;;  %v127_v52 = vadd.f32 %v126_v44, %v125_v36  ;;  %v153_v53 = vadd.f32 %v152_v45, %v151_v38  ;;  %v159_v54 = vrot.slane %v158_v46, 4 }
  0x1e   :  { %v114_v55 = vrot.slane %v113_v47, 1  ;;  %v134_v56 = vadd.f32 %v133_v48, %v132_v40  ;;  %v141_v57 = vadd.f32 %v140_v49, %v139_v41  ;;  %v147_v58 = vrot.slane %v146_v50, 2  ;;  %v262_v41 = vld [vmem:[%s661_s2] sm:$0xff] }
  0x1f   :  { %v121_v59 = vrot.slane %v120_v51, 1  ;;  %v128_v60 = vrot.slane %v127_v52, 1  ;;  %v154_v61 = vrot.slane %v153_v53, 2  ;;  %v160_v62 = vadd.f32 %v159_v54, %v158_v46 }
  0x20   :  { %v115_v63 = vadd.f32 %v114_v55, %v113_v47  ;;  %v135_v6 = vrot.slane %v134_v56, 1  ;;  %v142_v7 = vrot.slane %v141_v57, 1  ;;  %v148_v8 = vadd.f32 %v147_v58, %v146_v50 }
  0x21   :  { %v122_v11 = vadd.f32 %v121_v59, %v120_v51  ;;  %v129_v15 = vadd.f32 %v128_v60, %v127_v52  ;;  %v155_v16 = vadd.f32 %v154_v61, %v153_v53  ;;  %v161_v17 = vrot.slane %v160_v62, 2 }
  0x22   :  { %v136_v20 = vadd.f32 %v135_v6, %v134_v56  ;;  %v143_v0 = vadd.f32 %v142_v7, %v141_v57  ;;  %v149_v1 = vrot.slane %v148_v8, 1  ;;  %v165_v2 = vmul.f32 0.125, %v115_v63 }
  0x23   :  { %v156_v3 = vrot.slane %v155_v16, 1  ;;  %v162_v4 = vadd.f32 %v161_v17, %v160_v62  ;;  %v166_v23 = vmul.f32 0.125, %v122_v11  ;;  %v167_v24 = vmul.f32 0.125, %v129_v15 }
  0x24   :  { %v150_v25 = vadd.f32 %v149_v1, %v148_v8  ;;  %v168_v5 = vmul.f32 0.125, %v136_v20  ;;  %v169_v9 = vmul.f32 0.125, %v143_v0  ;;  %v173_v27 = vadd.f32 1e-05, %v165_v2 }
  0x25   :  { %v157_v28 = vadd.f32 %v156_v3, %v155_v16  ;;  %v163_v29 = vrot.slane %v162_v4, 1  ;;  %v174_v30 = vadd.f32 1e-05, %v166_v23  ;;  %v175_v31 = vadd.f32 1e-05, %v167_v24 }
  0x26   :  { %v170_v32 = vmul.f32 0.125, %v150_v25  ;;  %v176_v33 = vadd.f32 1e-05, %v168_v5  ;;  %v177_v34 = vadd.f32 1e-05, %v169_v9  ;;  %416 = vrsqrt.f32 %v173_v27 }
  0x27   :  { %v164_v10 = vadd.f32 %v163_v29, %v162_v4  ;;  %v171_v35 = vmul.f32 0.125, %v157_v28  ;;  %418 = vrsqrt.f32 %v174_v30  ;;  %vm348_vm7 = vcmask 1047559  }
  0x28   :  { %v178_v36 = vadd.f32 1e-05, %v170_v32  ;;  %420 = vrsqrt.f32 %v175_v31  ;;  %vm381_vm8 = vcmask 7168  }
  0x29   :  { %v172_v37 = vmul.f32 0.125, %v164_v10  ;;  %v179_v38 = vadd.f32 1e-05, %v171_v35  ;;  %422 = vrsqrt.f32 %v176_v33 }
  0x2a   :  { %424 = vrsqrt.f32 %v177_v34 }
  0x2b   :  { %v180_v39 = vadd.f32 1e-05, %v172_v37  ;;  %426 = vrsqrt.f32 %v178_v36 }
  0x2c   :  { %428 = vrsqrt.f32 %v179_v38 }
  0x2d   :  { %430 = vrsqrt.f32 %v180_v39 }
  0x30   :  { %v417_v40 = vpop.eup %416 }
  0x31   :  { %v419_v42 = vpop.eup %418  ;;  %v575_v43 = vmul.f32 %v417_v40, %v524_v12 }
  0x32   :  { %v421_v44 = vpop.eup %420  ;;  %v578_v45 = vmul.f32 %v419_v42, %v527_v13 }
  0x33   :  { %v423_v46 = vpop.eup %422  ;;  %v581_v47 = vmul.f32 %v421_v44, %v530_v14  ;;  %v263_v48 = vmul.f32 %v262_v41, %v575_v43 }
  0x34   :  { %v425_v49 = vpop.eup %424  ;;  %v585_v50 = vmul.f32 %v423_v46, %v533_v18  ;;  %v264_v51 = vmul.f32 %v262_v41, %v578_v45 }
  0x35   :  { %v427_v52 = vpop.eup %426  ;;  %v589_v12 = vmul.f32 %v425_v49, %v536_v19  ;;  %v265_v53 = vmul.f32 %v262_v41, %v581_v47  ;;  %v271_v13 = vsel %vm27_vm0, %v263_v48, 0.0 }
  0x36   :  { %v429_v54 = vpop.eup %428  ;;  %v594_v14 = vmul.f32 %v427_v52, %v545_v21  ;;  %v266_v55 = vmul.f32 %v262_v41, %v585_v50  ;;  %v272_v56 = vrot.slane %v271_v13, 4  ;;  %v278_v18 = vsel %vm27_vm0, %v264_v51, 0.0 }
  0x37   :  { %v431_v57 = vpop.eup %430  ;;  %v599_v58 = vmul.f32 %v429_v54, %v548_v22  ;;  %v267_v19 = vmul.f32 %v262_v41, %v589_v12  ;;  %v279_v59 = vrot.slane %v278_v18, 4  ;;  %v285_v60 = vsel %vm27_vm0, %v265_v53, 0.0 }
  0x38   :  { %v604_v61 = vmul.f32 %v431_v57, %v558_v26  ;;  %v268_v21 = vmul.f32 %v262_v41, %v594_v14  ;;  %v273_v62 = vadd.f32 %v272_v56, %v271_v13  ;;  %v286_v63 = vrot.slane %v285_v60, 4 }
  0x39   :  { %v269_v6 = vmul.f32 %v262_v41, %v599_v58  ;;  %v280_v7 = vadd.f32 %v279_v59, %v278_v18  ;;  %v292_v8 = vsel %vm27_vm0, %v266_v55, 0.0  ;;  %v299_v22 = vsel %vm27_vm0, %v267_v19, 0.0 }
  0x3a   :  { %v270_v11 = vmul.f32 %v262_v41, %v604_v61  ;;  %v274_v15 = vrot.slane %v273_v62, 2  ;;  %v287_v16 = vadd.f32 %v286_v63, %v285_v60  ;;  %v293_v17 = vrot.slane %v292_v8, 4 }
  0x3b   :  { %v281_v26 = vrot.slane %v280_v7, 2  ;;  %v300_v20 = vrot.slane %v299_v22, 4  ;;  %v306_v0 = vsel %vm27_vm0, %v268_v21, 0.0  ;;  %v313_v1 = vsel %vm27_vm0, %v269_v6, 0.0 }
  0x3c   :  { %v275_v2 = vadd.f32 %v274_v15, %v273_v62  ;;  %v288_v3 = vrot.slane %v287_v16, 2  ;;  %v294_v4 = vadd.f32 %v293_v17, %v292_v8  ;;  %v307_v23 = vrot.slane %v306_v0, 4 }
  0x3d   :  { %v282_v24 = vadd.f32 %v281_v26, %v280_v7  ;;  %v301_v25 = vadd.f32 %v300_v20, %v299_v22  ;;  %v314_v5 = vrot.slane %v313_v1, 4  ;;  %v320_v9 = vsel %vm27_vm0, %v270_v11, 0.0  ;;  %v197_v22 = vld [vmem:[%s662_s1] sm:$0xff] }
  0x3e   :  { %v276_v27 = vrot.slane %v275_v2, 1  ;;  %v289_v28 = vadd.f32 %v288_v3, %v287_v16  ;;  %v295_v29 = vrot.slane %v294_v4, 2  ;;  %v308_v30 = vadd.f32 %v307_v23, %v306_v0 }
  0x3f   :  { %v283_v31 = vrot.slane %v282_v24, 1  ;;  %v302_v32 = vrot.slane %v301_v25, 2  ;;  %v315_v33 = vadd.f32 %v314_v5, %v313_v1  ;;  %v321_v34 = vrot.slane %v320_v9, 4 }
  0x40   :  { %v277_v10 = vadd.f32 %v276_v27, %v275_v2  ;;  %v290_v35 = vrot.slane %v289_v28, 1  ;;  %v296_v36 = vadd.f32 %v295_v29, %v294_v4  ;;  %v309_v37 = vrot.slane %v308_v30, 2 }
  0x41   :  { %v284_v38 = vadd.f32 %v283_v31, %v282_v24  ;;  %v303_v39 = vadd.f32 %v302_v32, %v301_v25  ;;  %v316_v40 = vrot.slane %v315_v33, 2  ;;  %v322_v41 = vadd.f32 %v321_v34, %v320_v9 }
  0x42   :  { %v291_v42 = vadd.f32 %v290_v35, %v289_v28  ;;  %v297_v44 = vrot.slane %v296_v36, 1  ;;  %v310_v46 = vadd.f32 %v309_v37, %v308_v30  ;;  %v198_v11 = vmul.f32 %v197_v22, %v575_v43 }
  0x43   :  { %v304_v48 = vrot.slane %v303_v39, 1  ;;  %v317_v49 = vadd.f32 %v316_v40, %v315_v33  ;;  %v323_v51 = vrot.slane %v322_v41, 2  ;;  %v369_v52 = vsel %vm336_vm1, %v284_v38, %v277_v10 }
  0x44   :  { %v298_v53 = vadd.f32 %v297_v44, %v296_v36  ;;  %v311_v13 = vrot.slane %v310_v46, 1  ;;  %v370_v54 = vsel %vm338_vm2, %v291_v42, %v369_v52  ;;  %v199_v15 = vmul.f32 %v197_v22, %v578_v45 }
  0x45   :  { %v305_v55 = vadd.f32 %v304_v48, %v303_v39  ;;  %v318_v56 = vrot.slane %v317_v49, 1  ;;  %v324_v18 = vadd.f32 %v323_v51, %v322_v41  ;;  %v200_v16 = vmul.f32 %v197_v22, %v581_v47 }
  0x46   :  { %v312_v57 = vadd.f32 %v311_v13, %v310_v46  ;;  %v371_v19 = vsel %vm340_vm3, %v298_v53, %v370_v54  ;;  %v201_v17 = vmul.f32 %v197_v22, %v585_v50  ;;  %v206_v26 = vsel %vm27_vm0, %v198_v11, 0.0 }
  0x47   :  { %v319_v59 = vadd.f32 %v318_v56, %v317_v49  ;;  %v325_v60 = vrot.slane %v324_v18, 1  ;;  %v372_v21 = vsel %vm342_vm4, %v305_v55, %v371_v19  ;;  %v213_v20 = vsel %vm27_vm0, %v199_v15, 0.0 }
  0x48   :  { %v373_v62 = vsel %vm344_vm5, %v312_v57, %v372_v21  ;;  %v202_v0 = vmul.f32 %v197_v22, %v589_v12  ;;  %v207_v1 = vrot.slane %v206_v26, 4  ;;  %v214_v2 = vrot.slane %v213_v20, 4 }
  0x49   :  { %v326_v63 = vadd.f32 %v325_v60, %v324_v18  ;;  %v374_v6 = vsel %vm346_vm6, %v319_v59, %v373_v62  ;;  %v220_v3 = vsel %vm27_vm0, %v200_v16, 0.0  ;;  %v203_v4 = vmul.f32 %v197_v22, %v594_v14 }
  0x4a   :  { %v221_v23 = vrot.slane %v220_v3, 4  ;;  %v227_v43 = vsel %vm27_vm0, %v201_v17, 0.0  ;;  %v204_v45 = vmul.f32 %v197_v22, %v599_v58  ;;  %v208_v47 = vadd.f32 %v207_v1, %v206_v26 }
  0x4b   :  { %v375_v7 = vsel %vm348_vm7, %v326_v63, %v374_v6  ;;  %v215_v24 = vadd.f32 %v214_v2, %v213_v20  ;;  %v228_v50 = vrot.slane %v227_v43, 4  ;;  %v205_v25 = vmul.f32 %v197_v22, %v604_v61  ;;  %v414_v2 = vld [vmem:[%s663_s3] ss:$0 sm:$0xff]  ;;  %s436_s3 = smov 127  }
  0x4c   :  { %v377_v8 = vsel %vm27_vm0, %v375_v7, 0.0  ;;  %v222_v5 = vadd.f32 %v221_v23, %v220_v3  ;;  %v234_v9 = vsel %vm27_vm0, %v202_v0, 0.0  ;;  %v241_v12 = vsel %vm27_vm0, %v203_v4, 0.0 }
  0x4d   :  { %378 = vadd.xlane.f32.xlu0 %v377_v8  ;;  %v209_v27 = vrot.slane %v208_v47, 2  ;;  %v216_v28 = vrot.slane %v215_v24, 2  ;;  %v229_v29 = vadd.f32 %v228_v50, %v227_v43  ;;  %v235_v30 = vrot.slane %v234_v9, 4 }
  0x4e   :  { %v223_v14 = vrot.slane %v222_v5, 2  ;;  %v242_v31 = vrot.slane %v241_v12, 4  ;;  %v248_v32 = vsel %vm27_vm0, %v204_v45, 0.0  ;;  %v255_v58 = vsel %vm27_vm0, %v205_v25, 0.0 }
  0x4f   :  { %v210_v33 = vadd.f32 %v209_v27, %v208_v47  ;;  %v217_v34 = vadd.f32 %v216_v28, %v215_v24  ;;  %v230_v10 = vrot.slane %v229_v29, 2  ;;  %v236_v35 = vadd.f32 %v235_v30, %v234_v9 }
  0x50   :  { %v224_v61 = vadd.f32 %v223_v14, %v222_v5  ;;  %v243_v36 = vadd.f32 %v242_v31, %v241_v12  ;;  %v249_v37 = vrot.slane %v248_v32, 4  ;;  %v256_v38 = vrot.slane %v255_v58, 4 }
  0x51   :  { %v211_v39 = vrot.slane %v210_v33, 1  ;;  %v218_v40 = vrot.slane %v217_v34, 1  ;;  %v231_v41 = vadd.f32 %v230_v10, %v229_v29  ;;  %v237_v42 = vrot.slane %v236_v35, 2 }
  0x52   :  { %v225_v44 = vrot.slane %v224_v61, 1  ;;  %v244_v46 = vrot.slane %v243_v36, 2  ;;  %v250_v48 = vadd.f32 %v249_v37, %v248_v32  ;;  %v257_v49 = vadd.f32 %v256_v38, %v255_v58 }
  0x53   :  { %v212_v51 = vadd.f32 %v211_v39, %v210_v33  ;;  %v219_v52 = vadd.f32 %v218_v40, %v217_v34  ;;  %v232_v53 = vrot.slane %v231_v41, 1  ;;  %v238_v13 = vadd.f32 %v237_v42, %v236_v35 }
  0x54   :  { %v226_v54 = vadd.f32 %v225_v44, %v224_v61  ;;  %v245_v55 = vadd.f32 %v244_v46, %v243_v36  ;;  %v251_v56 = vrot.slane %v250_v48, 2  ;;  %v258_v18 = vrot.slane %v257_v49, 2 }
  0x55   :  { %v233_v57 = vadd.f32 %v232_v53, %v231_v41  ;;  %v239_v19 = vrot.slane %v238_v13, 1  ;;  %v337_v59 = vsel %vm336_vm1, %v219_v52, %v212_v51 }
  0x56   :  { %v246_v60 = vrot.slane %v245_v55, 1  ;;  %v252_v21 = vadd.f32 %v251_v56, %v250_v48  ;;  %v259_v62 = vadd.f32 %v258_v18, %v257_v49  ;;  %v339_v63 = vsel %vm338_vm2, %v226_v54, %v337_v59 }
  0x57   :  { %v240_v6 = vadd.f32 %v239_v19, %v238_v13  ;;  %v341_v7 = vsel %vm340_vm3, %v233_v57, %v339_v63 }
  0x58   :  { %v247_v8 = vadd.f32 %v246_v60, %v245_v55  ;;  %v253_v22 = vrot.slane %v252_v21, 1  ;;  %v260_v11 = vrot.slane %v259_v62, 1 }
  0x59   :  { %v343_v15 = vsel %vm342_vm4, %v240_v6, %v341_v7 }
  0x5a   :  { %v254_v16 = vadd.f32 %v253_v22, %v252_v21  ;;  %v261_v17 = vadd.f32 %v260_v11, %v259_v62  ;;  %v345_v26 = vsel %vm344_vm5, %v247_v8, %v343_v15 }
  0x5c   :  { %v347_v20 = vsel %vm346_vm6, %v254_v16, %v345_v26 }
  0x5d   :  { %v349_v0 = vsel %vm348_vm7, %v261_v17, %v347_v20 }
  0x5e   :  { %v351_v1 = vsel %vm27_vm0, %v349_v0, 0.0 }
  0x5f   :  { %352 = vadd.xlane.f32.xlu0 %v351_v1 }
  0xda   :  { %v379_v3 = vpop.xlane.xlu0 %378 }
  0xdb   :  { %v380_v4 = vadd.f32 %v414_v2, %v379_v3 }
  0xdd   :  { %v386_v23 = vand.u32 2147483647, %v380_v4  ;;  %v383_v30 = vmax.f32 %v380_v4, 0.0  ;;  %vm384_vm10 = vcmp.ne.f32.partialorder %v380_v4, %v380_v4 }
  0xdf   :  { %v387_v43 = vsub.f32 0.0, %v386_v23 }
  0xe1   :  { %v388_v45 = vmul.f32 1.442695, %v387_v43 }
  0xe3   :  { %432 = vpow2.f32 %v388_v45 }
  0xec   :  { %v353_v25 = vpop.xlane.xlu0 %352 }
  0xed   :  { %v433_v47 = vpop.eup %432  ;;  %v360_v5 = vadd.f32 %v414_v2, %v353_v25 }
  0xee   :  { %v390_v24 = vadd.f32 1.0, %v433_v47  ;;  %v393_v50 = vmul.f32 -0.5, %v433_v47  ;;  %v396_v12 = vand.u32 2147483647, %v433_v47 }
  0xef   :  { %382 = vst.msk [vmem:[%s664_s4] sm:$0xff] %vm381_vm8, %v360_v5 }
  0xf0   :  { %434 = vlog2.f32 %v390_v24  ;;  %v394_v9 = vadd.f32 1.0, %v393_v50  ;;  %vm397_vm9 = vcmp.lt.f32.partialorder %v396_v12, 0.0004427343 }
  0xf2   :  { %v395_v29 = vmul.f32 %v433_v47, %v394_v9 }
  0xfa   :  { %v435_v27 = vpop.eup %434 }
  0xfb   :  { %v392_v28 = vmul.f32 0.6931472, %v435_v27 }
  0xfd   :  { %v398_v14 = vsel %vm397_vm9, %v395_v29, %v392_v28 }
  0xfe   :  { %v399_v31 = vadd.f32 %v398_v14, %v383_v30 }
 0x100   :  { %v400_v32 = vsel %vm384_vm10, %v380_v4, %v399_v31 }
 0x101   :  { %402 = vrot.lane.b32.xlu1 %v400_v32, %s436_s3 }
 0x173   :  { %v403_v58 = vpop.permute.xlu1 %402 }
 0x174   :  { %405 = vst.msk [vmem:[%s665_s5] sm:$0xff] %vm381_vm8, %v403_v58 }

</bundles_post_ra>
